<compile_context>
chip_gen: v6e
topology: v6e:2x2x1
jax: 0.10.0
libtpu: 0.0.40
codegen_flags: <defaults>
</compile_context>

<pallas_src>
import functools

import jax
import jax.numpy as jnp
from jax.experimental import pallas as pl
from jax.experimental.pallas import tpu as pltpu

_LANE = 128
_FUSED_VMEM_BUDGET = 36 * 1024 * 1024   # gate for the fully-resident path
_FUSED_VMEM_LIMIT = 48 * 1024 * 1024    # below v7x's 64 MiB physical VMEM
_TILED_VMEM_LIMIT = 32 * 1024 * 1024


def _round_up(x, m):
    return ((x + m - 1) // m) * m


def _pad2d(x, rows, cols, dtype):
    out = jnp.zeros((rows, cols), dtype)
    return out.at[: x.shape[0], : x.shape[1]].set(x.astype(dtype))


# ----------------------------------------------------------------------------
# Path 1: whole network fused into one program (A and H resident in VMEM).
# ----------------------------------------------------------------------------
def _fused_gcn_kernel(a_ref, x_ref, *rest, num_layers):
    o_ref = rest[-1]
    wb_refs = rest[:-1]
    assert len(wb_refs) == 2 * num_layers

    a = a_ref[...].astype(jnp.bfloat16)                 # [N, N] 0/1 adjacency
    # In-kernel D^{-1/2}: row sums of A on the MXU with a 128-wide ones RHS
    # (f32 accumulation -> exact integer degrees), rsqrt on the EUP.
    ones = jnp.ones((a.shape[1], _LANE), jnp.bfloat16)
    deg = jnp.dot(a, ones, preferred_element_type=jnp.float32)[:, :1]
    s = jax.lax.rsqrt(jnp.maximum(deg, 1.0))            # DGL clamps degree at 1

    h = x_ref[...].astype(jnp.float32)                  # [N, F0_pad]

    for layer in range(num_layers):
        w = wb_refs[2 * layer][...]                     # bf16 [F_in_pad, F_out_pad]
        b = wb_refs[2 * layer + 1][...]                 # f32  [1, F_out_pad]
        f_in, f_out = w.shape

        if f_out <= f_in:
            # D^{-1/2} A (D^{-1/2} (H W)): N x N contraction on the narrower side.
            t = jnp.dot(h.astype(jnp.bfloat16), w,
                        preferred_element_type=jnp.float32)
            t = (t * s).astype(jnp.bfloat16)
            out = jnp.dot(a, t, preferred_element_type=jnp.float32) * s + b
        else:
            # ((D^{-1/2} A D^{-1/2} H) W): F_in is the narrower side.
            t = (h * s).astype(jnp.bfloat16)
            agg = jnp.dot(a, t, preferred_element_type=jnp.float32) * s
            out = jnp.dot(agg.astype(jnp.bfloat16), w,
                          preferred_element_type=jnp.float32) + b

        if layer != num_layers - 1:
            out = jnp.maximum(out, 0.0)
        # TODO(synk): training-mode dropout between layers (pltpu.prng_*) is
        # omitted; nn.Dropout is identity at inference time.
        h = out

    o_ref[...] = h.astype(o_ref.dtype)


def _fused_resident_bytes(n_pad, f_pads):
    f_max = max(f_pads)
    a_bytes = 3 * n_pad * n_pad                         # int8 input + bf16 copy
    h_bytes = 8 * 4 * n_pad * f_max                     # f32/bf16 temporaries
    wb_bytes = sum(f_pads[i] * f_pads[i + 1] * 2 + f_pads[i + 1] * 4
                   for i in range(len(f_pads) - 1))
    io_bytes = n_pad * f_pads[0] * 4 + n_pad * f_pads[-1] * 4
    deg_bytes = n_pad * _LANE * 4
    return a_bytes + h_bytes + wb_bytes + io_bytes + deg_bytes


def _fused_gcn_call(a_i8, x_pad, flat_wb, num_layers, n_pad, f_pads):
    f_last = f_pads[-1]

    flops = 2 * n_pad * n_pad * _LANE                   # in-kernel degree matmul
    for i in range(num_layers):
        fi, fo = f_pads[i], f_pads[i + 1]
        if fo <= fi:
            flops += 2 * n_pad * fi * fo + 2 * n_pad * n_pad * fo
        else:
            flops += 2 * n_pad * n_pad * fi + 2 * n_pad * fi * fo
    bytes_accessed = (a_i8.size + x_pad.size * 4 + n_pad * f_last * 4
                      + sum(int(v.size) * v.dtype.itemsize for v in flat_wb))

    kernel = functools.partial(_fused_gcn_kernel, num_layers=num_layers)
    n_inputs = 2 + 2 * num_layers
    return pl.pallas_call(
        kernel,
        out_shape=jax.ShapeDtypeStruct((n_pad, f_last), jnp.float32),
        in_specs=[pl.BlockSpec(memory_space=pltpu.MemorySpace.VMEM)
                  for _ in range(n_inputs)],
        out_specs=pl.BlockSpec(memory_space=pltpu.MemorySpace.VMEM),
        compiler_params=pltpu.CompilerParams(
            vmem_limit_bytes=_FUSED_VMEM_LIMIT),
        cost_estimate=pl.CostEstimate(flops=int(flops),
                                      transcendentals=int(n_pad),
                                      bytes_accessed=int(bytes_accessed)),
    )(a_i8, x_pad, *flat_wb)


# ----------------------------------------------------------------------------
# Path 2: per-layer tiled / pipelined kernel (scales past VMEM, uses megacore).
# ----------------------------------------------------------------------------
def _gcn_layer_tiled_kernel(a_ref, srow_ref, scol_ref, h_ref, w_ref, b_ref,
                            o_ref, acc_ref, *, apply_relu):
    k = pl.program_id(1)

    @pl.when(k == 0)
    def _():
        acc_ref[...] = jnp.zeros_like(acc_ref)

    a = a_ref[...].astype(jnp.bfloat16)                               # [tm, tk]
    t = (h_ref[...].astype(jnp.float32) * scol_ref[...]).astype(jnp.bfloat16)
    acc_ref[...] += jnp.dot(a, t, preferred_element_type=jnp.float32)

    @pl.when(k == pl.num_programs(1) - 1)
    def _():
        agg = (acc_ref[...] * srow_ref[...]).astype(jnp.bfloat16)     # [tm, F_in]
        out = jnp.dot(agg, w_ref[...],
                      preferred_element_type=jnp.float32) + b_ref[...]
        if apply_relu:
            out = jnp.maximum(out, 0.0)
        o_ref[...] = out.astype(o_ref.dtype)


def _gcn_layer_tiled(a_i8, inv_sqrt, h, w, b, *, tile, apply_relu, out_dtype):
    n_pad = a_i8.shape[0]
    f_in, f_out = w.shape
    grid = (n_pad // tile, n_pad // tile)

    flops = 2 * n_pad * n_pad * f_in + 2 * n_pad * f_in * f_out
    bytes_accessed = (n_pad * n_pad                              # int8 A, once
                      + grid[0] * n_pad * f_in * h.dtype.itemsize
                      + n_pad * f_out * jnp.dtype(out_dtype).itemsize
                      + int(w.size) * 2 + int(b.size) * 4 + 2 * n_pad * 4)

    kernel = functools.partial(_gcn_layer_tiled_kernel, apply_relu=apply_relu)
    return pl.pallas_call(
        kernel,
        out_shape=jax.ShapeDtypeStruct((n_pad, f_out), out_dtype),
        grid_spec=pltpu.PrefetchScalarGridSpec(
            num_scalar_prefetch=0,
            grid=grid,
            in_specs=[
                pl.BlockSpec((tile, tile), lambda i, k: (i, k)),    # A[i, k]
                pl.BlockSpec((tile, 1), lambda i, k: (i, 0)),       # D^-1/2 rows
                pl.BlockSpec((tile, 1), lambda i, k: (k, 0)),       # D^-1/2 cols
                pl.BlockSpec((tile, f_in), lambda i, k: (k, 0)),    # H[k]
                pl.BlockSpec((f_in, f_out), lambda i, k: (0, 0)),   # W
                pl.BlockSpec((1, f_out), lambda i, k: (0, 0)),      # b
            ],
            out_specs=pl.BlockSpec((tile, f_out), lambda i, k: (i, 0)),
            scratch_shapes=[pltpu.VMEM((tile, f_in), jnp.float32)],
        ),
        compiler_params=pltpu.CompilerParams(
            dimension_semantics=("parallel", "arbitrary"),
            vmem_limit_bytes=_TILED_VMEM_LIMIT),
        cost_estimate=pl.CostEstimate(flops=int(flops), transcendentals=0,
                                      bytes_accessed=int(bytes_accessed)),
    )(a_i8, inv_sqrt, inv_sqrt, h, w, b)


# ----------------------------------------------------------------------------
# Wrapper: GCN.forward on a dense adjacency.
# ----------------------------------------------------------------------------
def gcn_forward(adj, inputs, params, *, force_tiled=False):
    n = adj.shape[0]
    num_layers = len(params)
    num_classes = params[-1][0].shape[1]

    # Pad every feature width (input / hidden / classes) to 128 lanes.
    f_dims = [inputs.shape[1]] + [w.shape[1] for w, _ in params]
    f_pads = [_round_up(max(f, _LANE), _LANE) for f in f_dims]

    fused = (not force_tiled) and (
        _fused_resident_bytes(_round_up(n, 32), f_pads) <= _FUSED_VMEM_BUDGET)

    if fused:
        tile = None
        n_pad = _round_up(n, 32)            # int8 sublane-packing granularity
    else:
        tile = 512 if n >= 2048 else 256
        n_pad = _round_up(n, tile)

    # A stored in HBM as int8 (lossless for 0/1 adjacency), upcast to bf16
    # inside the kernel right before the MXU.
    # TODO(synk): weighted (non-0/1) adjacencies would need a bf16/f32 A path.
    a_i8 = _pad2d(adj, n_pad, n_pad, jnp.int8)
    x_pad = _pad2d(inputs, n_pad, f_pads[0], jnp.float32)

    flat_wb = []
    for i, (w, b) in enumerate(params):
        w_p = _pad2d(w, f_pads[i], f_pads[i + 1], jnp.bfloat16)
        b_p = _pad2d(b.reshape(1, -1), 1, f_pads[i + 1], jnp.float32)
        flat_wb += [w_p, b_p]

    if fused:
        out_pad = _fused_gcn_call(a_i8, x_pad, flat_wb, num_layers, n_pad, f_pads)
    else:
        # D^{-1/2} from the int8 adjacency: one N^2 x 1-byte pass, f32 accumulate.
        deg = jnp.sum(a_i8, axis=1, dtype=jnp.float32).reshape(n_pad, 1)
        inv_sqrt = jax.lax.rsqrt(jnp.maximum(deg, 1.0))
        h = x_pad
        for l in range(num_layers):
            last = l == num_layers - 1
            h = _gcn_layer_tiled(
                a_i8, inv_sqrt, h, flat_wb[2 * l], flat_wb[2 * l + 1],
                tile=tile, apply_relu=not last,
                out_dtype=jnp.float32 if last else jnp.bfloat16)
        out_pad = h

    return out_pad[:n, :num_classes]


def init_gcn_params(key, in_dim, num_hidden, num_classes, num_layers):
    """Deterministic Glorot-style init matching the GraphConv layer shapes."""
    dims = [in_dim] + [num_hidden] * (num_layers - 1) + [num_classes]
    params = []
    for i in range(num_layers):
        key, wk, bk = jax.random.split(key, 3)
        fan_in, fan_out = dims[i], dims[i + 1]
        scale = jnp.sqrt(6.0 / (fan_in + fan_out))
        w = jax.random.uniform(wk, (fan_in, fan_out), jnp.float32, -scale, scale)
        b = 0.1 * jax.random.normal(bk, (1, fan_out), jnp.float32)
        params.append((w, b))
    return params


def gcn_reference(adj, inputs, params):
    """Pure-JAX f32 reference of the same forward pass."""
    deg = jnp.maximum(jnp.sum(adj, axis=1), 1.0)
    inv = jax.lax.rsqrt(deg)
    a_hat = adj * inv[:, None] * inv[None, :]
    h = inputs
    for i, (w, b) in enumerate(params):
        h = a_hat @ (h @ w) + b.reshape(1, -1)
        if i != len(params) - 1:
            h = jnp.maximum(h, 0.0)
    return h


if __name__ == "__main__":
    key = jax.random.PRNGKey(0)

    # Small shapes consistent with the module's constructor.
    num_nodes, in_dim, num_hidden, num_classes, num_layers = 16, 32, 64, 8, 3
    k_feat, k_adj, k_param, k_feat2, k_adj2 = jax.random.split(key, 5)

    x = jax.random.normal(k_feat, (num_nodes, in_dim), jnp.float32)
    a = (jax.random.uniform(k_adj, (num_nodes, num_nodes)) < 0.3).astype(jnp.float32)
    a = jnp.maximum(a, a.T)
    a = jnp.maximum(a, jnp.eye(num_nodes, dtype=jnp.float32))
    params = init_gcn_params(k_param, in_dim, num_hidden, num_classes, num_layers)

    # 1) Fused (VMEM-resident) path.
    out = gcn_forward(a, x, params)
    jax.block_until_ready(out)
    assert out.shape == (num_nodes, num_classes)
    assert out.dtype == jnp.float32
    assert bool(jnp.all(jnp.isfinite(out)))
    ref = gcn_reference(a, x, params)
    rel = float(jnp.linalg.norm(out - ref) / (jnp.linalg.norm(ref) + 1e-6))
    assert rel < 5e-2, f"fused path relative error too large: {rel}"

    # 2) Tiled / pipelined path, forced, on a larger graph (2x2 grid of 256 tiles).
    n_big = 512
    x_big = jax.random.normal(k_feat2, (n_big, in_dim), jnp.float32)
    a_big = (jax.random.uniform(k_adj2, (n_big, n_big)) < 0.05).astype(jnp.float32)
    a_big = jnp.maximum(a_big, a_big.T)
    a_big = jnp.maximum(a_big, jnp.eye(n_big, dtype=jnp.float32))
    out_big = gcn_forward(a_big, x_big, params, force_tiled=True)
    jax.block_until_ready(out_big)
    assert out_big.shape == (n_big, num_classes)
    assert bool(jnp.all(jnp.isfinite(out_big)))
    ref_big = gcn_reference(a_big, x_big, params)
    rel_big = float(jnp.linalg.norm(out_big - ref_big) /
                    (jnp.linalg.norm(ref_big) + 1e-6))
    assert rel_big < 5e-2, f"tiled path relative error too large: {rel_big}"

    print("KERNEL_OK")
</pallas_src>

<mosaic_0001>
module attributes {stable_mosaic.version = 11 : i64} {
  func.func @_fused_gcn_kernel(%arg0: memref<32x32xi8, #tpu.memory_space<vmem>>, %arg1: memref<32x128xf32, #tpu.memory_space<vmem>>, %arg2: memref<128x128xbf16, #tpu.memory_space<vmem>>, %arg3: memref<1x128xf32, #tpu.memory_space<vmem>>, %arg4: memref<128x128xbf16, #tpu.memory_space<vmem>>, %arg5: memref<1x128xf32, #tpu.memory_space<vmem>>, %arg6: memref<128x128xbf16, #tpu.memory_space<vmem>>, %arg7: memref<1x128xf32, #tpu.memory_space<vmem>>, %arg8: memref<32x128xf32, #tpu.memory_space<vmem>>) attributes {dimension_semantics = [], scalar_prefetch = 0 : i64, scratch_operands = 0 : i64, tpu.core_type = #tpu.core_type<tc>} {
    %c0 = arith.constant 0 : index
    %c0_0 = arith.constant 0 : index
    %0 = vector.load %arg0[%c0, %c0_0] : memref<32x32xi8, #tpu.memory_space<vmem>>, vector<32x32xi8>
    %1 = arith.sitofp %0 : vector<32x32xi8> to vector<32x32xbf16>
    %cst = arith.constant 1.000000e+00 : bf16
    %2 = vector.broadcast %cst : bf16 to vector<32x128xbf16>
    %cst_1 = arith.constant dense<0.000000e+00> : vector<32x128xf32>
    %3 = tpu.matmul %1, %2, %cst_1 {dimension_numbers = #tpu.dot_dimension_numbers<[1], [0], [0], [1], [0, 0, 1, 1], [], []>} : vector<32x32xbf16>, vector<32x128xbf16>, vector<32x128xf32> -> vector<32x128xf32>
    %4 = vector.extract_strided_slice %3 {offsets = [0, 0], sizes = [32, 1], strides = [1, 1]} : vector<32x128xf32> to vector<32x1xf32>
    %cst_2 = arith.constant 1.000000e+00 : f32
    %5 = vector.broadcast %cst_2 : f32 to vector<32x1xf32>
    %6 = arith.maximumf %4, %5 : vector<32x1xf32>
    %7 = math.rsqrt %6 : vector<32x1xf32>
    %c0_3 = arith.constant 0 : index
    %c0_4 = arith.constant 0 : index
    %8 = vector.load %arg1[%c0_3, %c0_4] : memref<32x128xf32, #tpu.memory_space<vmem>>, vector<32x128xf32>
    %c0_5 = arith.constant 0 : index
    %c0_6 = arith.constant 0 : index
    %9 = vector.load %arg2[%c0_5, %c0_6] : memref<128x128xbf16, #tpu.memory_space<vmem>>, vector<128x128xbf16>
    %c0_7 = arith.constant 0 : index
    %c0_8 = arith.constant 0 : index
    %10 = vector.load %arg3[%c0_7, %c0_8] : memref<1x128xf32, #tpu.memory_space<vmem>>, vector<1x128xf32>
    %11 = arith.truncf %8 : vector<32x128xf32> to vector<32x128xbf16>
    %cst_9 = arith.constant dense<0.000000e+00> : vector<32x128xf32>
    %12 = tpu.matmul %11, %9, %cst_9 {dimension_numbers = #tpu.dot_dimension_numbers<[1], [0], [0], [1], [0, 0, 1, 1], [], []>} : vector<32x128xbf16>, vector<128x128xbf16>, vector<32x128xf32> -> vector<32x128xf32>
    %13 = vector.broadcast %7 : vector<32x1xf32> to vector<32x128xf32>
    %14 = arith.mulf %12, %13 : vector<32x128xf32>
    %15 = arith.truncf %14 : vector<32x128xf32> to vector<32x128xbf16>
    %cst_10 = arith.constant dense<0.000000e+00> : vector<32x128xf32>
    %16 = tpu.matmul %1, %15, %cst_10 {dimension_numbers = #tpu.dot_dimension_numbers<[1], [0], [0], [1], [0, 0, 1, 1], [], []>} : vector<32x32xbf16>, vector<32x128xbf16>, vector<32x128xf32> -> vector<32x128xf32>
    %17 = vector.broadcast %7 : vector<32x1xf32> to vector<32x128xf32>
    %18 = arith.mulf %16, %17 : vector<32x128xf32>
    %19 = vector.broadcast %10 : vector<1x128xf32> to vector<32x128xf32>
    %20 = arith.addf %18, %19 : vector<32x128xf32>
    %cst_11 = arith.constant 0.000000e+00 : f32
    %21 = vector.broadcast %cst_11 : f32 to vector<32x128xf32>
    %22 = arith.maximumf %20, %21 : vector<32x128xf32>
    %c0_12 = arith.constant 0 : index
    %c0_13 = arith.constant 0 : index
    %23 = vector.load %arg4[%c0_12, %c0_13] : memref<128x128xbf16, #tpu.memory_space<vmem>>, vector<128x128xbf16>
    %c0_14 = arith.constant 0 : index
    %c0_15 = arith.constant 0 : index
    %24 = vector.load %arg5[%c0_14, %c0_15] : memref<1x128xf32, #tpu.memory_space<vmem>>, vector<1x128xf32>
    %25 = arith.truncf %22 : vector<32x128xf32> to vector<32x128xbf16>
    %cst_16 = arith.constant dense<0.000000e+00> : vector<32x128xf32>
    %26 = tpu.matmul %25, %23, %cst_16 {dimension_numbers = #tpu.dot_dimension_numbers<[1], [0], [0], [1], [0, 0, 1, 1], [], []>} : vector<32x128xbf16>, vector<128x128xbf16>, vector<32x128xf32> -> vector<32x128xf32>
    %27 = vector.broadcast %7 : vector<32x1xf32> to vector<32x128xf32>
    %28 = arith.mulf %26, %27 : vector<32x128xf32>
    %29 = arith.truncf %28 : vector<32x128xf32> to vector<32x128xbf16>
    %cst_17 = arith.constant dense<0.000000e+00> : vector<32x128xf32>
    %30 = tpu.matmul %1, %29, %cst_17 {dimension_numbers = #tpu.dot_dimension_numbers<[1], [0], [0], [1], [0, 0, 1, 1], [], []>} : vector<32x32xbf16>, vector<32x128xbf16>, vector<32x128xf32> -> vector<32x128xf32>
    %31 = vector.broadcast %7 : vector<32x1xf32> to vector<32x128xf32>
    %32 = arith.mulf %30, %31 : vector<32x128xf32>
    %33 = vector.broadcast %24 : vector<1x128xf32> to vector<32x128xf32>
    %34 = arith.addf %32, %33 : vector<32x128xf32>
    %cst_18 = arith.constant 0.000000e+00 : f32
    %35 = vector.broadcast %cst_18 : f32 to vector<32x128xf32>
    %36 = arith.maximumf %34, %35 : vector<32x128xf32>
    %c0_19 = arith.constant 0 : index
    %c0_20 = arith.constant 0 : index
    %37 = vector.load %arg6[%c0_19, %c0_20] : memref<128x128xbf16, #tpu.memory_space<vmem>>, vector<128x128xbf16>
    %c0_21 = arith.constant 0 : index
    %c0_22 = arith.constant 0 : index
    %38 = vector.load %arg7[%c0_21, %c0_22] : memref<1x128xf32, #tpu.memory_space<vmem>>, vector<1x128xf32>
    %39 = arith.truncf %36 : vector<32x128xf32> to vector<32x128xbf16>
    %cst_23 = arith.constant dense<0.000000e+00> : vector<32x128xf32>
    %40 = tpu.matmul %39, %37, %cst_23 {dimension_numbers = #tpu.dot_dimension_numbers<[1], [0], [0], [1], [0, 0, 1, 1], [], []>} : vector<32x128xbf16>, vector<128x128xbf16>, vector<32x128xf32> -> vector<32x128xf32>
    %41 = vector.broadcast %7 : vector<32x1xf32> to vector<32x128xf32>
    %42 = arith.mulf %40, %41 : vector<32x128xf32>
    %43 = arith.truncf %42 : vector<32x128xf32> to vector<32x128xbf16>
    %cst_24 = arith.constant dense<0.000000e+00> : vector<32x128xf32>
    %44 = tpu.matmul %1, %43, %cst_24 {dimension_numbers = #tpu.dot_dimension_numbers<[1], [0], [0], [1], [0, 0, 1, 1], [], []>} : vector<32x32xbf16>, vector<32x128xbf16>, vector<32x128xf32> -> vector<32x128xf32>
    %45 = vector.broadcast %7 : vector<32x1xf32> to vector<32x128xf32>
    %46 = arith.mulf %44, %45 : vector<32x128xf32>
    %47 = vector.broadcast %38 : vector<1x128xf32> to vector<32x128xf32>
    %48 = arith.addf %46, %47 : vector<32x128xf32>
    %c0_25 = arith.constant 0 : index
    %c0_26 = arith.constant 0 : index
    %49 = vector.load %arg8[%c0_25, %c0_26] : memref<32x128xf32, #tpu.memory_space<vmem>>, vector<32x128xf32>
    tpu.vector_store %arg8[%c0_25, %c0_26], %48 {strides = array<i32>} : memref<32x128xf32, #tpu.memory_space<vmem>>, vector<32x128xf32>,
    return
  }
}

</mosaic_0001>

<bundles_post_ra>
// kernel: tpu_custom_call.1
= control target key start
LH: loop header
LB: loop body
LE: loop exit
PB: predicated region body
PF: predicated region fallthrough
CT: control target
= control target key end

     0   :  { %13 = vsyncpa [#allocation3], 0  ;;  %s1273_s0 = inlined_call_operand.hbm [shape: s8[32,32], index: 0, kind: input, shape index: {}]   ;;  %s1274_s1 = inlined_call_operand.hbm [shape: f32[32,128], index: 1, kind: input, shape index: {}]   ;;  %s1275_s2 = inlined_call_operand.hbm [shape: bf16[128,128], index: 2, kind: input, shape index: {}]   ;;  %s1276_s3 = inlined_call_operand.vmem [shape: f32[1,128], index: 3, kind: input, shape index: {}]   ;;  %s1277_s4 = inlined_call_operand.hbm [shape: bf16[128,128], index: 4, kind: input, shape index: {}]   ;;  %s1278_s5 = inlined_call_operand.vmem [shape: f32[1,128], index: 5, kind: input, shape index: {}]   ;;  %s1279_s6 = inlined_call_operand.hbm [shape: bf16[128,128], index: 6, kind: input, shape index: {}]   ;;  %s1280_s7 = inlined_call_operand.vmem [shape: f32[1,128], index: 7, kind: input, shape index: {}]   ;;  %s1281_s8 = inlined_call_operand.hbm [shape: f32[32,128], index: 8, kind: output, shape index: {}]  }
   0x1   :  { %14 = vsyncpa [#allocation6], 0 }
   0x2   :  { %15 = vsyncpa [#allocation9], 0 }
   0x3   :  { %16 = vsyncpa [#allocation4], 0  ;;  %s1122_s27 = smov [#allocation5]  }
   0x4   :  { %s32_s28 = sshll.u32 %s1122_s27, 4  ;;  %s33_s28 = int_to_ptr.vmem [resolvable:$true] %s32_s28 }
   0x5   :  { %s1002_s29 = scalar_lea.vmem %s33_s28, 512  ;;  %p1007_p1 = scmp.lt.s32.totalorder %s33_s28, %s33_s28 }
   0x6   :  { %p1003_p0 = scmp.ne.s32.totalorder %s33_s28, %s1002_s29  ;;  %p1008_p2 = scmp.lt.s32.totalorder %s1002_s29, %s1002_s29 }
   0x8   :  { %p1009_p3 = por %p1008_p2, %p1007_p1 }
   0xa   :  { %p1010_p4 = pnand %p1009_p3, %p1003_p0 }
   0xc   :  { %1013 = shalt.err (!%p1010_p4)
}
   0xd   :  { %s1123_s30 = smov 128   ;;  %s1124_s9 = smov 8  }
   0xe   :  { %38 = dma.hbm_to_vmem [thread:$0]  %s1274_s1, 512, %s33_s28, [#allocation6], %s1123_s30, %s1123_s30, %s1124_s9  }
   0xf   :  { %s1125_s12 = smov [#allocation8]   ;;  %s1126_s14 = smov [#allocation2]  }
  0x10   :  { %s58_s13 = sshll.u32 %s1125_s12, 4  ;;  %s23_s15 = sshll.u32 %s1126_s14, 4  ;;  %s59_s13 = int_to_ptr.vmem [resolvable:$true] %s58_s13  ;;  %s24_s15 = int_to_ptr.vmem [resolvable:$true] %s23_s15 }
  0x11   :  { %s1022_s16 = scalar_lea.vmem %s59_s13, 1024  ;;  %p1027_p6 = scmp.lt.s32.totalorder %s59_s13, %s59_s13 }
  0x12   :  { %p1023_p5 = scmp.ne.s32.totalorder %s59_s13, %s1022_s16  ;;  %p1028_p7 = scmp.lt.s32.totalorder %s1022_s16, %s1022_s16 }
  0x14   :  { %p1029_p8 = por %p1028_p7, %p1027_p6 }
  0x16   :  { %p1030_p9 = pnand %p1029_p8, %p1023_p5 }
  0x18   :  { %1033 = shalt.err (!%p1030_p9)
}
  0x19   :  { %s1127_s17 = smov 64   ;;  %s1128_s18 = smov 4  }
  0x1a   :  { %64 = dma.hbm_to_vmem [thread:$0]  %s1277_s4, 1024, %s59_s13, [#allocation9], %s1127_s17, %s1127_s17, %s1128_s18  }
  0x1b   :  { %s1042_s1 = scalar_lea.vmem %s24_s15, 128  ;;  %p1047_p11 = scmp.lt.s32.totalorder %s24_s15, %s24_s15 }
  0x1c   :  { %p1043_p10 = scmp.ne.s32.totalorder %s24_s15, %s1042_s1  ;;  %p1048_p12 = scmp.lt.s32.totalorder %s1042_s1, %s1042_s1 }
  0x1e   :  { %p1049_p13 = por %p1048_p12, %p1047_p11 }
  0x20   :  { %p1050_p0 = pnand %p1049_p13, %p1043_p10 }
  0x22   :  { %1053 = shalt.err (!%p1050_p0)
}
  0x23   :  { %26 = dma.hbm_to_vmem [thread:$0]  %s1273_s0, 128, %s24_s15, [#allocation3]  }
  0x24   :  { %s1129_s23 = smov [#allocation7]   ;;  %s1130_s25 = smov [#allocation10]  }
  0x25   :  { %s44_s24 = sshll.u32 %s1129_s23, 4  ;;  %s72_s26 = sshll.u32 %s1130_s25, 4  ;;  %s45_s24 = int_to_ptr.vmem [resolvable:$true] %s44_s24  ;;  %s73_s26 = int_to_ptr.vmem [resolvable:$true] %s72_s26 }
  0x26   :  { %s1062_s27 = scalar_lea.vmem %s45_s24, 1024  ;;  %p1067_p2 = scmp.lt.s32.totalorder %s45_s24, %s45_s24 }
  0x27   :  { %p1063_p1 = scmp.ne.s32.totalorder %s45_s24, %s1062_s27  ;;  %p1068_p3 = scmp.lt.s32.totalorder %s1062_s27, %s1062_s27 }
  0x29   :  { %p1069_p4 = por %p1068_p3, %p1067_p2 }
  0x2b   :  { %p1070_p5 = pnand %p1069_p4, %p1063_p1 }
  0x2d   :  { %1073 = shalt.err (!%p1070_p5)
}
  0x2e   :  { %50 = dma.hbm_to_vmem [thread:$0]  %s1275_s2, 1024, %s45_s24, [#allocation6], %s1127_s17, %s1127_s17, %s1128_s18  }
  0x2f   :  { %s1082_s0 = scalar_lea.vmem %s73_s26, 1024  ;;  %p1087_p7 = scmp.lt.s32.totalorder %s73_s26, %s73_s26 }
  0x30   :  { %p1083_p6 = scmp.ne.s32.totalorder %s73_s26, %s1082_s0  ;;  %p1088_p8 = scmp.lt.s32.totalorder %s1082_s0, %s1082_s0 }
  0x32   :  { %p1089_p9 = por %p1088_p8, %p1087_p7 }
  0x34   :  { %p1090_p10 = pnand %p1089_p9, %p1083_p6 }
  0x36   :  { %1093 = shalt.err (!%p1090_p10)
}
  0x37   :  { %78 = dma.hbm_to_vmem [thread:$0]  %s1279_s6, 1024, %s73_s26, [#allocation9], %s1127_s17, %s1127_s17, %s1128_s18  }
  0x38   :  { %1114 = dma.done.wait [#allocation3], 128  }
  0x39   :  { %1115 = vsyncadd [#allocation3], 4294967168 }
  0x3a   :  { %1116 = dma.done.wait [#allocation6], 1536  }
  0x3b   :  { %1117 = vsyncadd [#allocation6], 4294965760 }
  0x3c   :  { %1118 = dma.done.wait [#allocation9], 2048  }
  0x3d   :  { %1119 = vsyncadd [#allocation9], 4294965248  ;;  %v1131_v0 = vmov 1065369472   ;;  %v98_v1 = vld [vmem:[#allocation2] sm:$0xff]  ;;  %vm101_vm0 = vcmask 261120  }
  0x3e   :  { %856 = vmatprep.subr.bf16.mxu0 %v1131_v0  ;;  %v1206_v2 = vunpack.c.l.s8.bf16 %v98_v1  ;;  %v1208_v3 = vunpack.c.h.s8.bf16 %v98_v1  ;;  %v962_v4 = vld [vmem:[#allocation7 + $0x38] sm:$0xff]   ;;  %v963_v5 = vld [vmem:[#allocation7 + $0x30] sm:$0xff]   ;;  %v964_v6 = vld [vmem:[#allocation7 + $0x28] sm:$0xff]   ;;  %v1132_v18 = vmov 0   ;;  %s1133_s13 = smov [#allocation11]  }
  0x3f   :  { %857 = vmatpush3.bf16.msra.mxu0 %v1131_v0  ;;  %864 = vmatprep.subr.bf16.mxu1 %v962_v4  ;;  %v165_v7 = vld [vmem:[#allocation5] sm:$0xff]  ;;  %v166_v8 = vld [vmem:[#allocation5 + $0x8] sm:$0xff]  ;;  %v966_v11 = vld [vmem:[#allocation7 + $0x18] sm:$0xff]   ;;  %s761_s14 = sshll.u32 %s1133_s13, 4  ;;  %s762_s14 = int_to_ptr.vmem [resolvable:$true] %s761_s14 }
  0x40   :  { %858 = vmatprep.subr.bf16.mxu0 %v1131_v0  ;;  %860 = vmatprep.mubr.msk.bf16.mxu0 %vm101_vm0, %v1206_v2  ;;  %v965_v9 = vld [vmem:[#allocation7 + $0x20] sm:$0xff]   ;;  %v186_v10 = vpack.c.bf16 %v166_v8, %v165_v7  ;;  %v967_v12 = vld [vmem:[#allocation7 + $0x10] sm:$0xff]   ;;  %v968_v13 = vld [vmem:[#allocation7 + $0x8] sm:$0xff]   ;;  %p1099_p12 = scmp.lt.s32.totalorder %s762_s14, %s762_s14 }
  0x41   :  { %865 = vmatpush3.bf16.msra.mxu1 %v962_v4  ;;  %v969_v14 = vld [vmem:[#allocation7] sm:$0xff]   ;;  %v167_v15 = vld [vmem:[#allocation5 + $0x10] sm:$0xff]  ;;  %v168_v16 = vld [vmem:[#allocation5 + $0x18] sm:$0xff]  ;;  %960 = vset.pattern.permute.xlu0 %v1132_v18 }
  0x42   :  { %866 = vmatprep.subr.bf16.mxu1 %v963_v5  ;;  %880 = vmatprep.mubr.bf16.mxu1 %v186_v10  ;;  %v187_v17 = vpack.c.bf16 %v168_v16, %v167_v15  ;;  %v970_v45 = vld [vmem:[#allocation8 + $0x38] sm:$0xff]   ;;  %v971_v46 = vld [vmem:[#allocation8 + $0x30] sm:$0xff]   ;;  %v972_v47 = vld [vmem:[#allocation8 + $0x28] sm:$0xff]  }
  0x43   :  { %859 = vmatpush3.bf16.msra.mxu0 %v1131_v0  ;;  %961 = vset.pattern.permute.xlu1 %v1132_v18  ;;  %v973_v48 = vld [vmem:[#allocation8 + $0x20] sm:$0xff]   ;;  %v974_v49 = vld [vmem:[#allocation8 + $0x18] sm:$0xff]   ;;  %v975_v50 = vld [vmem:[#allocation8 + $0x10] sm:$0xff]  }
  0x44   :  { %v976_v51 = vld [vmem:[#allocation8 + $0x8] sm:$0xff]   ;;  %v977_v52 = vld [vmem:[#allocation8] sm:$0xff]   ;;  %v787_v58 = vld [vmem:[%s1276_s3] ss:$0 sm:$0xff] }
  0x45   :  { %867 = vmatpush3.bf16.msra.mxu1 %v963_v5  ;;  %v978_v10 = vld [vmem:[#allocation10 + $0x38] sm:$0xff]  }
  0x46   :  { %861 = vmatmul.mubr.msk.bf16.vlgmr.msra.gmra.mxu0 %vm101_vm0, %v1208_v3  ;;  %868 = vmatprep.subr.bf16.mxu1 %v964_v6 }
  0x47   :  { %888 = vmatprep.mubr.msk.bf16.mxu0 %vm101_vm0, %v1206_v2 }
  0x49   :  { %869 = vmatpush3.bf16.msra.mxu1 %v964_v6 }
  0x4a   :  { %870 = vmatprep.subr.bf16.mxu1 %v965_v9 }
  0x4d   :  { %871 = vmatpush3.bf16.msra.mxu1 %v965_v9 }
  0x4e   :  { %872 = vmatprep.subr.bf16.mxu1 %v966_v11 }
  0x51   :  { %873 = vmatpush3.bf16.msra.mxu1 %v966_v11  ;;  %v979_v11 = vld [vmem:[#allocation10 + $0x30] sm:$0xff]  }
  0x52   :  { %874 = vmatprep.subr.bf16.mxu1 %v967_v12 }
  0x55   :  { %875 = vmatpush3.bf16.msra.mxu1 %v967_v12  ;;  %v980_v12 = vld [vmem:[#allocation10 + $0x28] sm:$0xff]  }
  0x56   :  { %876 = vmatprep.subr.bf16.mxu1 %v968_v13 }
  0x59   :  { %877 = vmatpush3.bf16.msra.mxu1 %v968_v13  ;;  %v981_v13 = vld [vmem:[#allocation10 + $0x20] sm:$0xff]  }
  0x5a   :  { %878 = vmatprep.subr.bf16.mxu1 %v969_v14 }
  0x5d   :  { %879 = vmatpush3.bf16.msra.mxu1 %v969_v14 }
  0x5e   :  { %920 = vmatprep.subr.bf16.mxu1 %v978_v10 }
  0x60   :  { %881 = vmatmul.mubr.bf16.vlgmr.msra.gmra.mxu1 %v187_v17 }
  0x61   :  { %921 = vmatpush3.bf16.msra.mxu1 %v978_v10 }
  0x62   :  { %922 = vmatprep.subr.bf16.mxu1 %v979_v11 }
  0x65   :  { %923 = vmatpush3.bf16.msra.mxu1 %v979_v11 }
  0x66   :  { %924 = vmatprep.subr.bf16.mxu1 %v980_v12 }
  0x69   :  { %925 = vmatpush3.bf16.msra.mxu1 %v980_v12 }
  0x6a   :  { %926 = vmatprep.subr.bf16.mxu1 %v981_v13 }
  0x6d   :  { %927 = vmatpush3.bf16.msra.mxu1 %v981_v13 }
 0x106   :  { %v862_v19 = vpop.f32.mrf.mxu0 }
 0x107   :  { %v159_v20 = vmax.f32 %v862_v19, 1.0 }
 0x108   :  { %v142_v21 = vpop.f32.mrf.mxu0 }
 0x109   :  { %986 = vrsqrt.f32 %v159_v20  ;;  %v157_v22 = vmax.f32 %v142_v21, 1.0 }
 0x10a   :  { %v863_v23 = vpop.f32.mrf.mxu0 }
 0x10b   :  { %988 = vrsqrt.f32 %v157_v22  ;;  %v160_v24 = vmax.f32 %v863_v23, 1.0 }
 0x10c   :  { %v145_v25 = vpop.f32.mrf.mxu0 }
 0x10d   :  { %990 = vrsqrt.f32 %v160_v24  ;;  %v158_v26 = vmax.f32 %v145_v25, 1.0  ;;  %v982_v24 = vld [vmem:[#allocation10 + $0x18] sm:$0xff]   ;;  %v983_v25 = vld [vmem:[#allocation10 + $0x10] sm:$0xff]  }
 0x10e   :  { %928 = vmatprep.subr.bf16.mxu1 %v982_v24 }
 0x10f   :  { %992 = vrsqrt.f32 %v158_v26  ;;  %929 = vmatpush3.bf16.msra.mxu1 %v982_v24  ;;  %v984_v26 = vld [vmem:[#allocation10 + $0x8] sm:$0xff]  }
 0x110   :  { %930 = vmatprep.subr.bf16.mxu1 %v983_v25 }
 0x113   :  { %931 = vmatpush3.bf16.msra.mxu1 %v983_v25 }
 0x114   :  { %932 = vmatprep.subr.bf16.mxu1 %v984_v26 }
 0x116   :  { %v987_v27 = vpop.eup %986 }
 0x117   :  { %297 = vperm.xlu0 %960, %v987_v27   ;;  %933 = vmatpush3.bf16.msra.mxu1 %v984_v26  ;;  %v985_v27 = vld [vmem:[#allocation10] sm:$0xff]  }
 0x118   :  { %v989_v28 = vpop.eup %988  ;;  %934 = vmatprep.subr.bf16.mxu1 %v985_v27 }
 0x119   :  { %287 = vperm.xlu1 %961, %v989_v28  }
 0x11a   :  { %v991_v29 = vpop.eup %990 }
 0x11b   :  { %302 = vperm.xlu0 %960, %v991_v29   ;;  %935 = vmatpush3.bf16.msra.mxu1 %v985_v27 }
 0x11c   :  { %v993_v30 = vpop.eup %992 }
 0x11d   :  { %292 = vperm.xlu1 %961, %v993_v30  }
 0x120   :  { %v882_v31 = vpop.f32.mrf.mxu1 }
 0x122   :  { %v270_v32 = vpop.f32.mrf.mxu1 }
 0x124   :  { %v883_v34 = vpop.f32.mrf.mxu1 }
 0x126   :  { %v273_v39 = vpop.f32.mrf.mxu1 }
 0x192   :  { %v1216_v33 = vpop.permute.xlu0 %297 }
 0x193   :  { %v307_v37 = vmul.f32 %v882_v31, %v1216_v33 }
 0x194   :  { %v1218_v35 = vpop.permute.xlu1 %287 }
 0x195   :  { %v305_v42 = vmul.f32 %v1218_v35, %v270_v32 }
 0x196   :  { %v1220_v36 = vpop.permute.xlu0 %302 }
 0x197   :  { %v308_v38 = vmul.f32 %v883_v34, %v1220_v36 }
 0x198   :  { %v1224_v40 = vpop.permute.xlu1 %292 }
 0x199   :  { %v310_v41 = vpack.c.bf16 %v308_v38, %v307_v37  ;;  %v306_v43 = vmul.f32 %v1224_v40, %v273_v39 }
 0x19b   :  { %884 = vmatprep.subr.bf16.mxu0 %v310_v41  ;;  %v309_v44 = vpack.c.bf16 %v306_v43, %v305_v42 }
 0x19c   :  { %885 = vmatpush3.bf16.msra.mxu0 %v310_v41 }
 0x19d   :  { %886 = vmatprep.subr.bf16.mxu0 %v309_v44 }
 0x1a0   :  { %887 = vmatpush3.bf16.msra.mxu0 %v309_v44 }
 0x1a1   :  { %892 = vmatprep.subr.bf16.mxu0 %v970_v45 }
 0x1a3   :  { %889 = vmatmul.mubr.msk.bf16.vlgmr.msra.gmra.mxu0 %vm101_vm0, %v1208_v3 }
 0x1a4   :  { %893 = vmatpush3.bf16.msra.mxu0 %v970_v45 }
 0x1a5   :  { %894 = vmatprep.subr.bf16.mxu0 %v971_v46 }
 0x1a8   :  { %895 = vmatpush3.bf16.msra.mxu0 %v971_v46 }
 0x1a9   :  { %896 = vmatprep.subr.bf16.mxu0 %v972_v47 }
 0x1ac   :  { %897 = vmatpush3.bf16.msra.mxu0 %v972_v47 }
 0x1ad   :  { %898 = vmatprep.subr.bf16.mxu0 %v973_v48 }
 0x1b0   :  { %899 = vmatpush3.bf16.msra.mxu0 %v973_v48 }
 0x1b1   :  { %900 = vmatprep.subr.bf16.mxu0 %v974_v49 }
 0x1b4   :  { %901 = vmatpush3.bf16.msra.mxu0 %v974_v49 }
 0x1b5   :  { %902 = vmatprep.subr.bf16.mxu0 %v975_v50 }
 0x1b8   :  { %903 = vmatpush3.bf16.msra.mxu0 %v975_v50 }
 0x1b9   :  { %904 = vmatprep.subr.bf16.mxu0 %v976_v51 }
 0x1bc   :  { %905 = vmatpush3.bf16.msra.mxu0 %v976_v51 }
 0x1bd   :  { %906 = vmatprep.subr.bf16.mxu0 %v977_v52 }
 0x1c0   :  { %907 = vmatpush3.bf16.msra.mxu0 %v977_v52 }
 0x263   :  { %v890_v53 = vpop.f32.mrf.mxu0 }
 0x264   :  { %v362_v56 = vmul.f32 %v890_v53, %v1216_v33 }
 0x265   :  { %v345_v54 = vpop.f32.mrf.mxu0 }
 0x266   :  { %v360_v55 = vmul.f32 %v345_v54, %v1218_v35  ;;  %v372_v0 = vadd.f32 %v787_v58, %v362_v56 }
 0x267   :  { %v891_v57 = vpop.f32.mrf.mxu0 }
 0x268   :  { %v363_v59 = vmul.f32 %v891_v57, %v1220_v36  ;;  %v370_v61 = vadd.f32 %v787_v58, %v360_v55  ;;  %v376_v7 = vmax.f32 %v372_v0, 0.0 }
 0x269   :  { %v348_v60 = vpop.f32.mrf.mxu0 }
 0x26a   :  { %v373_v62 = vadd.f32 %v787_v58, %v363_v59  ;;  %v361_v63 = vmul.f32 %v348_v60, %v1224_v40  ;;  %v374_v5 = vmax.f32 %v370_v61, 0.0  ;;  %v809_v60 = vld [vmem:[%s1280_s7] ss:$0 sm:$0xff]  ;;  %s1094_s7 = scalar_lea.vmem %s762_s14, 512 }
 0x26b   :  { %p1095_p11 = scmp.ne.s32.totalorder %s762_s14, %s1094_s7  ;;  %p1100_p13 = scmp.lt.s32.totalorder %s1094_s7, %s1094_s7 }
 0x26c   :  { %v371_v1 = vadd.f32 %v787_v58, %v361_v63  ;;  %v377_v4 = vmax.f32 %v373_v62, 0.0 }
 0x26d   :  { %p1101_p0 = por %p1100_p13, %p1099_p12 }
 0x26e   :  { %v375_v6 = vmax.f32 %v371_v1, 0.0  ;;  %v396_v9 = vpack.c.bf16 %v377_v4, %v376_v7 }
 0x26f   :  { %p1102_p1 = pnand %p1101_p0, %p1095_p11 }
 0x270   :  { %v395_v8 = vpack.c.bf16 %v375_v6, %v374_v5 }
 0x272   :  { %908 = vmatprep.mubr.bf16.mxu0 %v395_v8 }
 0x273   :  { %909 = vmatmul.mubr.bf16.vlgmr.msra.gmra.mxu0 %v396_v9 }
 0x274   :  { %916 = vmatprep.mubr.msk.bf16.mxu0 %vm101_vm0, %v1206_v2 }
 0x333   :  { %v910_v14 = vpop.f32.mrf.mxu0 }
 0x334   :  { %v496_v17 = vmul.f32 %v910_v14, %v1216_v33 }
 0x335   :  { %v479_v15 = vpop.f32.mrf.mxu0 }
 0x336   :  { %v494_v20 = vmul.f32 %v479_v15, %v1218_v35 }
 0x337   :  { %v911_v16 = vpop.f32.mrf.mxu0 }
 0x338   :  { %v497_v18 = vmul.f32 %v911_v16, %v1220_v36 }
 0x339   :  { %v482_v19 = vpop.f32.mrf.mxu0 }
 0x33a   :  { %v499_v21 = vpack.c.bf16 %v497_v18, %v496_v17  ;;  %v495_v22 = vmul.f32 %v482_v19, %v1224_v40 }
 0x33c   :  { %v498_v23 = vpack.c.bf16 %v495_v22, %v494_v20  ;;  %912 = vmatprep.subr.bf16.mxu0 %v499_v21 }
 0x33d   :  { %913 = vmatpush3.bf16.msra.mxu0 %v499_v21 }
 0x33e   :  { %914 = vmatprep.subr.bf16.mxu0 %v498_v23 }
 0x341   :  { %915 = vmatpush3.bf16.msra.mxu0 %v498_v23 }
 0x344   :  { %917 = vmatmul.mubr.msk.bf16.vlgmr.msra.gmra.mxu0 %vm101_vm0, %v1208_v3 }
 0x345   :  { %944 = vmatprep.mubr.msk.bf16.mxu0 %vm101_vm0, %v1206_v2  ;;  %v798_v2 = vld [vmem:[%s1278_s5] ss:$0 sm:$0xff] }
 0x404   :  { %v918_v28 = vpop.f32.mrf.mxu0 }
 0x405   :  { %v551_v31 = vmul.f32 %v918_v28, %v1216_v33 }
 0x406   :  { %v534_v29 = vpop.f32.mrf.mxu0 }
 0x407   :  { %v549_v30 = vmul.f32 %v534_v29, %v1218_v35  ;;  %v561_v42 = vadd.f32 %v798_v2, %v551_v31 }
 0x408   :  { %v919_v32 = vpop.f32.mrf.mxu0 }
 0x409   :  { %v552_v34 = vmul.f32 %v919_v32, %v1220_v36  ;;  %v559_v38 = vadd.f32 %v798_v2, %v549_v30  ;;  %v565_v47 = vmax.f32 %v561_v42, 0.0 }
 0x40a   :  { %v537_v37 = vpop.f32.mrf.mxu0 }
 0x40b   :  { %v562_v39 = vadd.f32 %v798_v2, %v552_v34  ;;  %v550_v41 = vmul.f32 %v537_v37, %v1224_v40  ;;  %v563_v45 = vmax.f32 %v559_v38, 0.0 }
 0x40d   :  { %v560_v43 = vadd.f32 %v798_v2, %v550_v41  ;;  %v566_v44 = vmax.f32 %v562_v39, 0.0 }
 0x40f   :  { %v564_v46 = vmax.f32 %v560_v43, 0.0  ;;  %v585_v49 = vpack.c.bf16 %v566_v44, %v565_v47 }
 0x411   :  { %v584_v48 = vpack.c.bf16 %v564_v46, %v563_v45 }
 0x413   :  { %936 = vmatprep.mubr.bf16.mxu1 %v584_v48 }
 0x414   :  { %937 = vmatmul.mubr.bf16.vlgmr.msra.gmra.mxu1 %v585_v49 }
 0x4d4   :  { %v938_v50 = vpop.f32.mrf.mxu1 }
 0x4d5   :  { %v685_v53 = vmul.f32 %v938_v50, %v1216_v33 }
 0x4d6   :  { %v668_v51 = vpop.f32.mrf.mxu1 }
 0x4d7   :  { %v683_v56 = vmul.f32 %v668_v51, %v1218_v35 }
 0x4d8   :  { %v939_v52 = vpop.f32.mrf.mxu1 }
 0x4d9   :  { %v686_v54 = vmul.f32 %v939_v52, %v1220_v36 }
 0x4da   :  { %v671_v55 = vpop.f32.mrf.mxu1 }
 0x4db   :  { %v688_v57 = vpack.c.bf16 %v686_v54, %v685_v53  ;;  %v684_v58 = vmul.f32 %v671_v55, %v1224_v40 }
 0x4dd   :  { %v687_v59 = vpack.c.bf16 %v684_v58, %v683_v56  ;;  %940 = vmatprep.subr.bf16.mxu0 %v688_v57 }
 0x4de   :  { %941 = vmatpush3.bf16.msra.mxu0 %v688_v57 }
 0x4df   :  { %942 = vmatprep.subr.bf16.mxu0 %v687_v59 }
 0x4e2   :  { %943 = vmatpush3.bf16.msra.mxu0 %v687_v59 }
 0x4e5   :  { %945 = vmatmul.mubr.msk.bf16.vlgmr.msra.gmra.mxu0 %vm101_vm0, %v1208_v3 }
 0x5a5   :  { %v946_v61 = vpop.f32.mrf.mxu0 }
 0x5a6   :  { %v740_v62 = vmul.f32 %v946_v61, %v1216_v33 }
 0x5a7   :  { %v723_v63 = vpop.f32.mrf.mxu0 }
 0x5a8   :  { %v750_v0 = vadd.f32 %v809_v60, %v740_v62  ;;  %v738_v1 = vmul.f32 %v723_v63, %v1218_v35 }
 0x5a9   :  { %v947_v4 = vpop.f32.mrf.mxu0 }
 0x5aa   :  { %754 = vst [vmem:[#allocation11 + $0x10] sm:$0xff] %v750_v0  ;;  %v748_v5 = vadd.f32 %v809_v60, %v738_v1  ;;  %v741_v6 = vmul.f32 %v947_v4, %v1220_v36 }
 0x5ab   :  { %v726_v7 = vpop.f32.mrf.mxu0 }
 0x5ac   :  { %752 = vst [vmem:[#allocation11] sm:$0xff] %v748_v5  ;;  %v751_v3 = vadd.f32 %v809_v60, %v741_v6  ;;  %v739_v8 = vmul.f32 %v726_v7, %v1224_v40 }
 0x5ae   :  { %755 = vst [vmem:[#allocation11 + $0x18] sm:$0xff] %v751_v3  ;;  %v749_v9 = vadd.f32 %v809_v60, %v739_v8 }
 0x5b0   :  { %753 = vst [vmem:[#allocation11 + $0x8] sm:$0xff] %v749_v9 }
 0x5b1   :  { %1105 = shalt.err (!%p1102_p1)
}
 0x5b2   :  { %767 = dma.vmem_to_hbm [thread:$0]  %s762_s14, 512, %s1281_s8, [#allocation4], %s1123_s30, %s1123_s30, %s1124_s9  }
 0x5b3   :  { %1120 = dma.done.wait [#allocation4], 512  }
 0x5b4   :  { %1121 = vsyncadd [#allocation4], 4294966784 }
 0x5b5   :  { %771 = vsyncpa [#allocation3], 1 }
 0x5b6   :  { %772 = vsyncpa [#allocation6], 1 }
 0x5b7   :  { %773 = vsyncpa [#allocation9], 1 }
 0x5b8   :  { %774 = vsyncpa [#allocation4], 1 }

</bundles_post_ra>
